<compile_context>
chip_gen: v6e
topology: v6e:2x2x1
jax: 0.10.0
libtpu: 0.0.40
codegen_flags: <defaults>
</compile_context>

<pallas_src>
import functools

import jax
import jax.numpy as jnp
from jax.experimental import pallas as pl
from jax.experimental.pallas import tpu as pltpu

IN_DIM = 3
HID = 60
SLOT = 64                     # lane slot per 60-wide field (4 spare lanes)
N_SLOTS = 16
SLAB_COLS = N_SLOTS * SLOT    # 1024 = 8 * 128 -> lane-dense writeback


def _round_up(n, m):
    return ((n + m - 1) // m) * m


def chair_mlp_kernel(x_ref, w1t_ref, w234t_ref, w5t_ref, bias_ref,
                     out_ref, aug_ref):
    """Processes a tile of TB query points.

    aug_ref is a (5*TB, 60) VMEM scratch holding, field-major,
        rows 0*TB..3*TB : P   (masked weight chain, 3 rows / point)
        rows 3*TB..4*TB : Bv  (masked bias chain,   1 row  / point)
        rows 4*TB..5*TB : h   (forward activations, 1 row  / point)
    so each hidden layer is ONE (5*TB,60)x(60,60) MXU dot whose TB-row blocks
    give alk_w rows, alk_b and the forward pre-activation for every point.
    """
    f32 = jnp.float32
    TB = x_ref.shape[0]

    def dot(a, b):
        # Default MXU precision (matches the pure-JAX reference tolerance).
        return jnp.dot(a, b, preferred_element_type=f32)

    x = x_ref[...]                           # (TB, 3)
    w1t = w1t_ref[...]                       # (3, 60)
    b1 = bias_ref[0:1, 0:HID]                # (1, 60)

    # ---- layer 1 ----
    pre = dot(x, w1t) + b1                   # (TB, 60)
    s = (pre > 0.0).astype(f32)              # activation pattern s1
    h = pre * s                              # == relu(pre)
    out_ref[:, 0:HID] = s                    # slot 0 <- s1
    for j in range(IN_DIM):                  # P = W1^T masked per point
        aug_ref[j * TB:(j + 1) * TB, :] = w1t[j:j + 1, :] * s
    aug_ref[3 * TB:4 * TB, :] = b1 * s       # Bv
    aug_ref[4 * TB:5 * TB, :] = h            # h

    # ---- layers 2..4: one fused tall matmul per layer ----
    for k in range(3):
        wkt = w234t_ref[k]                   # (60, 60) = W_{k+2}^T
        bk = bias_ref[k + 1:k + 2, 0:HID]    # (1, 60)
        m = dot(aug_ref[...], wkt)           # (5*TB, 60)
        pre = m[4 * TB:5 * TB, :] + bk       # forward pre-activation
        s = (pre > 0.0).astype(f32)          # s_{k+2}
        h = pre * s
        alk_b = m[3 * TB:4 * TB, :] + bk     # bias row of alk_{k+2}

        out_ref[:, SLOT * (k + 1):SLOT * (k + 1) + HID] = s
        base = 4 * (k + 1)                   # alk_{k+2} occupies slots base..base+3
        for j in range(IN_DIM):
            mj = m[j * TB:(j + 1) * TB, :]                       # alk_w row j
            out_ref[:, SLOT * (base + j):SLOT * (base + j) + HID] = mj
            aug_ref[j * TB:(j + 1) * TB, :] = mj * s             # next P
        out_ref[:, SLOT * (base + 3):SLOT * (base + 3) + HID] = alk_b
        aug_ref[3 * TB:4 * TB, :] = alk_b * s                    # next Bv
        aug_ref[4 * TB:5 * TB, :] = h                            # next h

    # ---- layer 5 (no ReLU): zerosurface + final output ----
    w5t = w5t_ref[...]                       # (60, 1)
    b5 = bias_ref[4:5, 0:1]                  # (1, 1)
    m5 = dot(aug_ref[...], w5t)              # (5*TB, 1)
    for j in range(IN_DIM):                  # zerosurface weight rows -> lanes 60..62
        out_ref[:, HID + j:HID + j + 1] = m5[j * TB:(j + 1) * TB, :]
    out_ref[:, HID + 3:HID + 4] = m5[3 * TB:4 * TB, :] + b5            # lane 63: zs bias
    out_ref[:, SLOT + HID:SLOT + HID + 1] = m5[4 * TB:5 * TB, :] + b5  # lane 124: x


def pack_chair_params(params):
    """One-time packing of PyTorch-layout params into kernel operands.

    params = (W1, b1, W2, b2, W3, b3, W4, b4, W5, b5) with W in (out, in) layout.
    Returns (w1t (3,60), w234t (3,60,60), w5t (60,1), bias (8,64)).
    """
    w1, b1, w2, b2, w3, b3, w4, b4, w5, b5 = [jnp.asarray(p, jnp.float32)
                                              for p in params]
    w1t = w1.T
    w234t = jnp.stack([w2.T, w3.T, w4.T])
    w5t = w5.T
    bias = jnp.zeros((8, SLOT), jnp.float32)
    bias = bias.at[0, 0:HID].set(b1)
    bias = bias.at[1, 0:HID].set(b2)
    bias = bias.at[2, 0:HID].set(b3)
    bias = bias.at[3, 0:HID].set(b4)
    bias = bias.at[4, 0:1].set(b5)
    return w1t, w234t, w5t, bias


def _chair_mlp_call(xp, w1t, w234t, w5t, bias, tile):
    bp = xp.shape[0]
    return pl.pallas_call(
        chair_mlp_kernel,
        out_shape=jax.ShapeDtypeStruct((bp, SLAB_COLS), jnp.float32),
        grid=(bp // tile,),
        in_specs=[
            pl.BlockSpec((tile, IN_DIM), lambda i: (i, 0)),    # query points
            pl.BlockSpec((IN_DIM, HID), lambda i: (0, 0)),     # W1^T
            pl.BlockSpec((3, HID, HID), lambda i: (0, 0, 0)),  # W2..W4 ^T
            pl.BlockSpec((HID, 1), lambda i: (0, 0)),          # W5^T
            pl.BlockSpec((8, SLOT), lambda i: (0, 0)),         # bias table
        ],
        out_specs=pl.BlockSpec((tile, SLAB_COLS), lambda i: (i, 0)),
        scratch_shapes=[pltpu.VMEM((5 * tile, HID), jnp.float32)],
        compiler_params=pltpu.CompilerParams(
            dimension_semantics=("parallel",)),
    )(xp, w1t, w234t, w5t, bias)


@functools.partial(jax.jit, static_argnames=("tile",))
def chair_mlp_forward(x, packed, tile=256):
    """x: (B, 3) query points; packed = pack_chair_params(params).

    Returns (out_x (B,1,1),
             [S_t (B,4,60), alk1..alk4 (B,4,60), zerosurface (B,4,1)]).
    """
    w1t, w234t, w5t, bias = packed
    x = jnp.asarray(x, jnp.float32)
    if x.ndim == 1:
        x = x[None, :]
    batch = x.shape[0]
    tb = _round_up(min(tile, _round_up(batch, 8)), 8)   # TB multiple of 8
    bp = _round_up(batch, tb)
    xp = jnp.pad(x, ((0, bp - batch), (0, 0)))
    slab = _chair_mlp_call(xp, w1t, w234t, w5t, bias, tb)[:batch]

    def field(slot0):
        return slab[:, SLOT * slot0:SLOT * (slot0 + 4)].reshape(
            batch, 4, SLOT)[:, :, :HID]

    s_t = field(0)
    alk2, alk3, alk4 = field(4), field(8), field(12)
    # alk1 = [W1^T; b1] is independent of the query point: broadcast, no writeback.
    alk1 = jnp.broadcast_to(
        jnp.concatenate([w1t, bias[0:1, 0:HID]], axis=0), (batch, 4, HID))
    zs = slab[:, HID:HID + 4][:, :, None]                    # (B, 4, 1)
    out_x = slab[:, SLOT + HID:SLOT + HID + 1][:, :, None]   # (B, 1, 1)
    return out_x, [s_t, alk1, alk2, alk3, alk4, zs]


def ref_forward(x, params):
    """Pure-JAX mirror of the PyTorch module for a single (1, 3) point."""
    w1, b1, w2, b2, w3, b3, w4, b4, w5, b5 = params

    def nstate(h, w, b):
        s = (h[0] != 0.0).astype(jnp.float32)          # (out,)
        wl = (w * s[:, None]).T                        # (in, out)
        bb = (b * s)[None, :]                          # (1, out)
        return s, wl, bb

    relu = jax.nn.relu
    h1 = relu(x @ w1.T + b1)
    s1, wl1, bias1 = nstate(h1, w1, b1)
    alk1 = jnp.concatenate([w1.T, b1[None, :]], axis=0)
    h2 = relu(h1 @ w2.T + b2)
    s2, wl2, bias2 = nstate(h2, w2, b2)
    alk2 = jnp.concatenate([wl1 @ w2.T, bias1 @ w2.T + b2[None, :]], axis=0)
    h3 = relu(h2 @ w3.T + b3)
    s3, wl3, bias3 = nstate(h3, w3, b3)
    alk3 = jnp.concatenate([wl1 @ wl2 @ w3.T,
                            (bias1 @ wl2 + bias2) @ w3.T + b3[None, :]], axis=0)
    h4 = relu(h3 @ w4.T + b4)
    s4, wl4, bias4 = nstate(h4, w4, b4)
    alk4 = jnp.concatenate([wl1 @ wl2 @ wl3 @ w4.T,
                            ((bias1 @ wl2 + bias2) @ wl3 + bias3) @ w4.T + b4[None, :]],
                           axis=0)
    out = h4 @ w5.T + b5
    zs_b = (((bias1 @ wl2 + bias2) @ wl3 + bias3) @ wl4 + bias4) @ w5.T + b5[None, :]
    zs_w = wl1 @ wl2 @ wl3 @ wl4 @ w5.T
    zs = jnp.concatenate([zs_w, zs_b], axis=0)
    s_t = jnp.stack([s1, s2, s3, s4], axis=0)
    return out, [s_t, alk1, alk2, alk3, alk4, zs]


if __name__ == "__main__":
    key = jax.random.PRNGKey(0)
    keys = jax.random.split(key, 11)
    # deterministic synthetic parameters (PyTorch (out, in) weight layout)
    params = (
        jax.random.normal(keys[0], (HID, IN_DIM), jnp.float32) * 0.5,
        jax.random.normal(keys[1], (HID,), jnp.float32) * 0.1,
        jax.random.normal(keys[2], (HID, HID), jnp.float32) * 0.2,
        jax.random.normal(keys[3], (HID,), jnp.float32) * 0.1,
        jax.random.normal(keys[4], (HID, HID), jnp.float32) * 0.2,
        jax.random.normal(keys[5], (HID,), jnp.float32) * 0.1,
        jax.random.normal(keys[6], (HID, HID), jnp.float32) * 0.2,
        jax.random.normal(keys[7], (HID,), jnp.float32) * 0.1,
        jax.random.normal(keys[8], (1, HID), jnp.float32) * 0.2,
        jax.random.normal(keys[9], (1,), jnp.float32) * 0.1,
    )
    B = 36                                     # not a tile multiple -> tests padding
    x = jax.random.normal(keys[10], (B, IN_DIM), jnp.float32)

    packed = pack_chair_params(params)         # one-time packing (hoisted)
    # Small demo tile (8 points) -> 5 grid steps; real workloads use tile≈256.
    out_x, extras = chair_mlp_forward(x, packed, tile=8)
    jax.block_until_ready(out_x)
    for e in extras:
        jax.block_until_ready(e)

    # validate every point against the per-point pure-JAX reference
    for b in range(B):
        ref_x, ref_extras = ref_forward(x[b:b + 1], params)
        assert out_x[b].shape == ref_x.shape
        assert jnp.allclose(out_x[b], ref_x, atol=1e-4, rtol=1e-4)
        for got, want in zip(extras, ref_extras):
            assert got[b].shape == want.shape
            assert jnp.allclose(got[b], want, atol=1e-4, rtol=1e-4)

    print("KERNEL_OK")
</pallas_src>

<mosaic_0001>
module attributes {stable_mosaic.version = 11 : i64} {
  func.func @chair_mlp_kernel(%arg0: i32, %arg1: memref<8x3xf32, #tpu.memory_space<vmem>>, %arg2: memref<3x60xf32, #tpu.memory_space<vmem>>, %arg3: memref<3x60x60xf32, #tpu.memory_space<vmem>>, %arg4: memref<60x1xf32, #tpu.memory_space<vmem>>, %arg5: memref<8x64xf32, #tpu.memory_space<vmem>>, %arg6: memref<8x1024xf32, #tpu.memory_space<vmem>>, %arg7: memref<40x60xf32, #tpu.memory_space<vmem>>) attributes {dimension_semantics = [#tpu.dimension_semantics<parallel>], iteration_bounds = array<i64: 5>, scalar_prefetch = 0 : i64, scratch_operands = 1 : i64, tpu.core_type = #tpu.core_type<tc>, window_params = [{transform_indices = @transform_0, window_bounds = array<i64: 8, 3>}, {pipeline_mode = #tpu.pipeline_mode<synchronous>, transform_indices = @transform_1, window_bounds = array<i64: 3, 60>}, {pipeline_mode = #tpu.pipeline_mode<synchronous>, transform_indices = @transform_2, window_bounds = array<i64: 3, 60, 60>}, {pipeline_mode = #tpu.pipeline_mode<synchronous>, transform_indices = @transform_3, window_bounds = array<i64: 60, 1>}, {pipeline_mode = #tpu.pipeline_mode<synchronous>, transform_indices = @transform_4, window_bounds = array<i64: 8, 64>}, {transform_indices = @transform_5, window_bounds = array<i64: 8, 1024>}]} {
    %c0 = arith.constant 0 : index
    %c0_0 = arith.constant 0 : index
    %0 = vector.load %arg1[%c0, %c0_0] : memref<8x3xf32, #tpu.memory_space<vmem>>, vector<8x3xf32>
    %c0_1 = arith.constant 0 : index
    %c0_2 = arith.constant 0 : index
    %1 = vector.load %arg2[%c0_1, %c0_2] : memref<3x60xf32, #tpu.memory_space<vmem>>, vector<3x60xf32>
    %c0_3 = arith.constant 0 : index
    %c0_4 = arith.constant 0 : index
    %2 = vector.load %arg5[%c0_3, %c0_4] : memref<8x64xf32, #tpu.memory_space<vmem>>, vector<1x60xf32>
    %cst = arith.constant dense<0.000000e+00> : vector<8x60xf32>
    %3 = tpu.matmul %0, %1, %cst {dimension_numbers = #tpu.dot_dimension_numbers<[1], [0], [0], [1], [0, 0, 1, 1], [], []>} : vector<8x3xf32>, vector<3x60xf32>, vector<8x60xf32> -> vector<8x60xf32>
    %4 = vector.broadcast %2 : vector<1x60xf32> to vector<8x60xf32>
    %5 = arith.addf %3, %4 : vector<8x60xf32>
    %cst_5 = arith.constant 0.000000e+00 : f32
    %6 = vector.broadcast %cst_5 : f32 to vector<8x60xf32>
    %7 = arith.cmpf ogt, %5, %6 : vector<8x60xf32>
    %8 = arith.extui %7 : vector<8x60xi1> to vector<8x60xi32>
    %9 = arith.sitofp %8 : vector<8x60xi32> to vector<8x60xf32>
    %10 = arith.mulf %5, %9 : vector<8x60xf32>
    %c0_6 = arith.constant 0 : index
    %c0_7 = arith.constant 0 : index
    %11 = vector.load %arg6[%c0_6, %c0_7] : memref<8x1024xf32, #tpu.memory_space<vmem>>, vector<8x60xf32>
    tpu.vector_store %arg6[%c0_6, %c0_7], %9 {strides = array<i32>} : memref<8x1024xf32, #tpu.memory_space<vmem>>, vector<8x60xf32>,
    %12 = vector.extract_strided_slice %1 {offsets = [0, 0], sizes = [1, 60], strides = [1, 1]} : vector<3x60xf32> to vector<1x60xf32>
    %13 = vector.broadcast %12 : vector<1x60xf32> to vector<8x60xf32>
    %14 = arith.mulf %13, %9 : vector<8x60xf32>
    %c0_8 = arith.constant 0 : index
    %c0_9 = arith.constant 0 : index
    %15 = vector.load %arg7[%c0_8, %c0_9] : memref<40x60xf32, #tpu.memory_space<vmem>>, vector<8x60xf32>
    tpu.vector_store %arg7[%c0_8, %c0_9], %14 {strides = array<i32>} : memref<40x60xf32, #tpu.memory_space<vmem>>, vector<8x60xf32>,
    %16 = vector.extract_strided_slice %1 {offsets = [1, 0], sizes = [1, 60], strides = [1, 1]} : vector<3x60xf32> to vector<1x60xf32>
    %17 = vector.broadcast %16 : vector<1x60xf32> to vector<8x60xf32>
    %18 = arith.mulf %17, %9 : vector<8x60xf32>
    %c8 = arith.constant 8 : index
    %c0_10 = arith.constant 0 : index
    %19 = vector.load %arg7[%c8, %c0_10] : memref<40x60xf32, #tpu.memory_space<vmem>>, vector<8x60xf32>
    tpu.vector_store %arg7[%c8, %c0_10], %18 {strides = array<i32>} : memref<40x60xf32, #tpu.memory_space<vmem>>, vector<8x60xf32>,
    %20 = vector.extract_strided_slice %1 {offsets = [2, 0], sizes = [1, 60], strides = [1, 1]} : vector<3x60xf32> to vector<1x60xf32>
    %21 = vector.broadcast %20 : vector<1x60xf32> to vector<8x60xf32>
    %22 = arith.mulf %21, %9 : vector<8x60xf32>
    %c16 = arith.constant 16 : index
    %c0_11 = arith.constant 0 : index
    %23 = vector.load %arg7[%c16, %c0_11] : memref<40x60xf32, #tpu.memory_space<vmem>>, vector<8x60xf32>
    tpu.vector_store %arg7[%c16, %c0_11], %22 {strides = array<i32>} : memref<40x60xf32, #tpu.memory_space<vmem>>, vector<8x60xf32>,
    %24 = vector.broadcast %2 : vector<1x60xf32> to vector<8x60xf32>
    %25 = arith.mulf %24, %9 : vector<8x60xf32>
    %c24 = arith.constant 24 : index
    %c0_12 = arith.constant 0 : index
    %26 = vector.load %arg7[%c24, %c0_12] : memref<40x60xf32, #tpu.memory_space<vmem>>, vector<8x60xf32>
    tpu.vector_store %arg7[%c24, %c0_12], %25 {strides = array<i32>} : memref<40x60xf32, #tpu.memory_space<vmem>>, vector<8x60xf32>,
    %c32 = arith.constant 32 : index
    %c0_13 = arith.constant 0 : index
    %27 = vector.load %arg7[%c32, %c0_13] : memref<40x60xf32, #tpu.memory_space<vmem>>, vector<8x60xf32>
    tpu.vector_store %arg7[%c32, %c0_13], %10 {strides = array<i32>} : memref<40x60xf32, #tpu.memory_space<vmem>>, vector<8x60xf32>,
    %c0_14 = arith.constant 0 : index
    %c0_15 = arith.constant 0 : index
    %c0_16 = arith.constant 0 : index
    %28 = vector.load %arg3[%c0_14, %c0_15, %c0_16] : memref<3x60x60xf32, #tpu.memory_space<vmem>>, vector<1x60x60xf32>
    %29 = vector.shape_cast %28 : vector<1x60x60xf32> to vector<60x60xf32>
    %c1 = arith.constant 1 : index
    %c0_17 = arith.constant 0 : index
    %30 = vector.load %arg5[%c1, %c0_17] : memref<8x64xf32, #tpu.memory_space<vmem>>, vector<1x60xf32>
    %c0_18 = arith.constant 0 : index
    %c0_19 = arith.constant 0 : index
    %31 = vector.load %arg7[%c0_18, %c0_19] : memref<40x60xf32, #tpu.memory_space<vmem>>, vector<40x60xf32>
    %cst_20 = arith.constant dense<0.000000e+00> : vector<40x60xf32>
    %32 = tpu.matmul %31, %29, %cst_20 {dimension_numbers = #tpu.dot_dimension_numbers<[1], [0], [0], [1], [0, 0, 1, 1], [], []>} : vector<40x60xf32>, vector<60x60xf32>, vector<40x60xf32> -> vector<40x60xf32>
    %33 = vector.extract_strided_slice %32 {offsets = [32, 0], sizes = [8, 60], strides = [1, 1]} : vector<40x60xf32> to vector<8x60xf32>
    %34 = vector.broadcast %30 : vector<1x60xf32> to vector<8x60xf32>
    %35 = arith.addf %33, %34 : vector<8x60xf32>
    %cst_21 = arith.constant 0.000000e+00 : f32
    %36 = vector.broadcast %cst_21 : f32 to vector<8x60xf32>
    %37 = arith.cmpf ogt, %35, %36 : vector<8x60xf32>
    %38 = arith.extui %37 : vector<8x60xi1> to vector<8x60xi32>
    %39 = arith.sitofp %38 : vector<8x60xi32> to vector<8x60xf32>
    %40 = arith.mulf %35, %39 : vector<8x60xf32>
    %41 = vector.extract_strided_slice %32 {offsets = [24, 0], sizes = [8, 60], strides = [1, 1]} : vector<40x60xf32> to vector<8x60xf32>
    %42 = vector.broadcast %30 : vector<1x60xf32> to vector<8x60xf32>
    %43 = arith.addf %41, %42 : vector<8x60xf32>
    %c0_22 = arith.constant 0 : index
    %c64 = arith.constant 64 : index
    %44 = vector.load %arg6[%c0_22, %c64] : memref<8x1024xf32, #tpu.memory_space<vmem>>, vector<8x60xf32>
    tpu.vector_store %arg6[%c0_22, %c64], %39 {strides = array<i32>} : memref<8x1024xf32, #tpu.memory_space<vmem>>, vector<8x60xf32>,
    %45 = vector.extract_strided_slice %32 {offsets = [0, 0], sizes = [8, 60], strides = [1, 1]} : vector<40x60xf32> to vector<8x60xf32>
    %c0_23 = arith.constant 0 : index
    %c256 = arith.constant 256 : index
    %46 = vector.load %arg6[%c0_23, %c256] : memref<8x1024xf32, #tpu.memory_space<vmem>>, vector<8x60xf32>
    tpu.vector_store %arg6[%c0_23, %c256], %45 {strides = array<i32>} : memref<8x1024xf32, #tpu.memory_space<vmem>>, vector<8x60xf32>,
    %47 = arith.mulf %45, %39 : vector<8x60xf32>
    %c0_24 = arith.constant 0 : index
    %c0_25 = arith.constant 0 : index
    %48 = vector.load %arg7[%c0_24, %c0_25] : memref<40x60xf32, #tpu.memory_space<vmem>>, vector<8x60xf32>
    tpu.vector_store %arg7[%c0_24, %c0_25], %47 {strides = array<i32>} : memref<40x60xf32, #tpu.memory_space<vmem>>, vector<8x60xf32>,
    %49 = vector.extract_strided_slice %32 {offsets = [8, 0], sizes = [8, 60], strides = [1, 1]} : vector<40x60xf32> to vector<8x60xf32>
    %c0_26 = arith.constant 0 : index
    %c320 = arith.constant 320 : index
    %50 = vector.load %arg6[%c0_26, %c320] : memref<8x1024xf32, #tpu.memory_space<vmem>>, vector<8x60xf32>
    tpu.vector_store %arg6[%c0_26, %c320], %49 {strides = array<i32>} : memref<8x1024xf32, #tpu.memory_space<vmem>>, vector<8x60xf32>,
    %51 = arith.mulf %49, %39 : vector<8x60xf32>
    %c8_27 = arith.constant 8 : index
    %c0_28 = arith.constant 0 : index
    %52 = vector.load %arg7[%c8_27, %c0_28] : memref<40x60xf32, #tpu.memory_space<vmem>>, vector<8x60xf32>
    tpu.vector_store %arg7[%c8_27, %c0_28], %51 {strides = array<i32>} : memref<40x60xf32, #tpu.memory_space<vmem>>, vector<8x60xf32>,
    %53 = vector.extract_strided_slice %32 {offsets = [16, 0], sizes = [8, 60], strides = [1, 1]} : vector<40x60xf32> to vector<8x60xf32>
    %c0_29 = arith.constant 0 : index
    %c384 = arith.constant 384 : index
    %54 = vector.load %arg6[%c0_29, %c384] : memref<8x1024xf32, #tpu.memory_space<vmem>>, vector<8x60xf32>
    tpu.vector_store %arg6[%c0_29, %c384], %53 {strides = array<i32>} : memref<8x1024xf32, #tpu.memory_space<vmem>>, vector<8x60xf32>,
    %55 = arith.mulf %53, %39 : vector<8x60xf32>
    %c16_30 = arith.constant 16 : index
    %c0_31 = arith.constant 0 : index
    %56 = vector.load %arg7[%c16_30, %c0_31] : memref<40x60xf32, #tpu.memory_space<vmem>>, vector<8x60xf32>
    tpu.vector_store %arg7[%c16_30, %c0_31], %55 {strides = array<i32>} : memref<40x60xf32, #tpu.memory_space<vmem>>, vector<8x60xf32>,
    %c0_32 = arith.constant 0 : index
    %c448 = arith.constant 448 : index
    %57 = vector.load %arg6[%c0_32, %c448] : memref<8x1024xf32, #tpu.memory_space<vmem>>, vector<8x60xf32>
    tpu.vector_store %arg6[%c0_32, %c448], %43 {strides = array<i32>} : memref<8x1024xf32, #tpu.memory_space<vmem>>, vector<8x60xf32>,
    %58 = arith.mulf %43, %39 : vector<8x60xf32>
    %c24_33 = arith.constant 24 : index
    %c0_34 = arith.constant 0 : index
    %59 = vector.load %arg7[%c24_33, %c0_34] : memref<40x60xf32, #tpu.memory_space<vmem>>, vector<8x60xf32>
    tpu.vector_store %arg7[%c24_33, %c0_34], %58 {strides = array<i32>} : memref<40x60xf32, #tpu.memory_space<vmem>>, vector<8x60xf32>,
    %c32_35 = arith.constant 32 : index
    %c0_36 = arith.constant 0 : index
    %60 = vector.load %arg7[%c32_35, %c0_36] : memref<40x60xf32, #tpu.memory_space<vmem>>, vector<8x60xf32>
    tpu.vector_store %arg7[%c32_35, %c0_36], %40 {strides = array<i32>} : memref<40x60xf32, #tpu.memory_space<vmem>>, vector<8x60xf32>,
    %c1_37 = arith.constant 1 : index
    %c0_38 = arith.constant 0 : index
    %c0_39 = arith.constant 0 : index
    %61 = vector.load %arg3[%c1_37, %c0_38, %c0_39] : memref<3x60x60xf32, #tpu.memory_space<vmem>>, vector<1x60x60xf32>
    %62 = vector.shape_cast %61 : vector<1x60x60xf32> to vector<60x60xf32>
    %c2 = arith.constant 2 : index
    %c0_40 = arith.constant 0 : index
    %63 = vector.load %arg5[%c2, %c0_40] : memref<8x64xf32, #tpu.memory_space<vmem>>, vector<1x60xf32>
    %c0_41 = arith.constant 0 : index
    %c0_42 = arith.constant 0 : index
    %64 = vector.load %arg7[%c0_41, %c0_42] : memref<40x60xf32, #tpu.memory_space<vmem>>, vector<40x60xf32>
    %cst_43 = arith.constant dense<0.000000e+00> : vector<40x60xf32>
    %65 = tpu.matmul %64, %62, %cst_43 {dimension_numbers = #tpu.dot_dimension_numbers<[1], [0], [0], [1], [0, 0, 1, 1], [], []>} : vector<40x60xf32>, vector<60x60xf32>, vector<40x60xf32> -> vector<40x60xf32>
    %66 = vector.extract_strided_slice %65 {offsets = [32, 0], sizes = [8, 60], strides = [1, 1]} : vector<40x60xf32> to vector<8x60xf32>
    %67 = vector.broadcast %63 : vector<1x60xf32> to vector<8x60xf32>
    %68 = arith.addf %66, %67 : vector<8x60xf32>
    %cst_44 = arith.constant 0.000000e+00 : f32
    %69 = vector.broadcast %cst_44 : f32 to vector<8x60xf32>
    %70 = arith.cmpf ogt, %68, %69 : vector<8x60xf32>
    %71 = arith.extui %70 : vector<8x60xi1> to vector<8x60xi32>
    %72 = arith.sitofp %71 : vector<8x60xi32> to vector<8x60xf32>
    %73 = arith.mulf %68, %72 : vector<8x60xf32>
    %74 = vector.extract_strided_slice %65 {offsets = [24, 0], sizes = [8, 60], strides = [1, 1]} : vector<40x60xf32> to vector<8x60xf32>
    %75 = vector.broadcast %63 : vector<1x60xf32> to vector<8x60xf32>
    %76 = arith.addf %74, %75 : vector<8x60xf32>
    %c0_45 = arith.constant 0 : index
    %c128 = arith.constant 128 : index
    %77 = vector.load %arg6[%c0_45, %c128] : memref<8x1024xf32, #tpu.memory_space<vmem>>, vector<8x60xf32>
    tpu.vector_store %arg6[%c0_45, %c128], %72 {strides = array<i32>} : memref<8x1024xf32, #tpu.memory_space<vmem>>, vector<8x60xf32>,
    %78 = vector.extract_strided_slice %65 {offsets = [0, 0], sizes = [8, 60], strides = [1, 1]} : vector<40x60xf32> to vector<8x60xf32>
    %c0_46 = arith.constant 0 : index
    %c512 = arith.constant 512 : index
    %79 = vector.load %arg6[%c0_46, %c512] : memref<8x1024xf32, #tpu.memory_space<vmem>>, vector<8x60xf32>
    tpu.vector_store %arg6[%c0_46, %c512], %78 {strides = array<i32>} : memref<8x1024xf32, #tpu.memory_space<vmem>>, vector<8x60xf32>,
    %80 = arith.mulf %78, %72 : vector<8x60xf32>
    %c0_47 = arith.constant 0 : index
    %c0_48 = arith.constant 0 : index
    %81 = vector.load %arg7[%c0_47, %c0_48] : memref<40x60xf32, #tpu.memory_space<vmem>>, vector<8x60xf32>
    tpu.vector_store %arg7[%c0_47, %c0_48], %80 {strides = array<i32>} : memref<40x60xf32, #tpu.memory_space<vmem>>, vector<8x60xf32>,
    %82 = vector.extract_strided_slice %65 {offsets = [8, 0], sizes = [8, 60], strides = [1, 1]} : vector<40x60xf32> to vector<8x60xf32>
    %c0_49 = arith.constant 0 : index
    %c576 = arith.constant 576 : index
    %83 = vector.load %arg6[%c0_49, %c576] : memref<8x1024xf32, #tpu.memory_space<vmem>>, vector<8x60xf32>
    tpu.vector_store %arg6[%c0_49, %c576], %82 {strides = array<i32>} : memref<8x1024xf32, #tpu.memory_space<vmem>>, vector<8x60xf32>,
    %84 = arith.mulf %82, %72 : vector<8x60xf32>
    %c8_50 = arith.constant 8 : index
    %c0_51 = arith.constant 0 : index
    %85 = vector.load %arg7[%c8_50, %c0_51] : memref<40x60xf32, #tpu.memory_space<vmem>>, vector<8x60xf32>
    tpu.vector_store %arg7[%c8_50, %c0_51], %84 {strides = array<i32>} : memref<40x60xf32, #tpu.memory_space<vmem>>, vector<8x60xf32>,
    %86 = vector.extract_strided_slice %65 {offsets = [16, 0], sizes = [8, 60], strides = [1, 1]} : vector<40x60xf32> to vector<8x60xf32>
    %c0_52 = arith.constant 0 : index
    %c640 = arith.constant 640 : index
    %87 = vector.load %arg6[%c0_52, %c640] : memref<8x1024xf32, #tpu.memory_space<vmem>>, vector<8x60xf32>
    tpu.vector_store %arg6[%c0_52, %c640], %86 {strides = array<i32>} : memref<8x1024xf32, #tpu.memory_space<vmem>>, vector<8x60xf32>,
    %88 = arith.mulf %86, %72 : vector<8x60xf32>
    %c16_53 = arith.constant 16 : index
    %c0_54 = arith.constant 0 : index
    %89 = vector.load %arg7[%c16_53, %c0_54] : memref<40x60xf32, #tpu.memory_space<vmem>>, vector<8x60xf32>
    tpu.vector_store %arg7[%c16_53, %c0_54], %88 {strides = array<i32>} : memref<40x60xf32, #tpu.memory_space<vmem>>, vector<8x60xf32>,
    %c0_55 = arith.constant 0 : index
    %c704 = arith.constant 704 : index
    %90 = vector.load %arg6[%c0_55, %c704] : memref<8x1024xf32, #tpu.memory_space<vmem>>, vector<8x60xf32>
    tpu.vector_store %arg6[%c0_55, %c704], %76 {strides = array<i32>} : memref<8x1024xf32, #tpu.memory_space<vmem>>, vector<8x60xf32>,
    %91 = arith.mulf %76, %72 : vector<8x60xf32>
    %c24_56 = arith.constant 24 : index
    %c0_57 = arith.constant 0 : index
    %92 = vector.load %arg7[%c24_56, %c0_57] : memref<40x60xf32, #tpu.memory_space<vmem>>, vector<8x60xf32>
    tpu.vector_store %arg7[%c24_56, %c0_57], %91 {strides = array<i32>} : memref<40x60xf32, #tpu.memory_space<vmem>>, vector<8x60xf32>,
    %c32_58 = arith.constant 32 : index
    %c0_59 = arith.constant 0 : index
    %93 = vector.load %arg7[%c32_58, %c0_59] : memref<40x60xf32, #tpu.memory_space<vmem>>, vector<8x60xf32>
    tpu.vector_store %arg7[%c32_58, %c0_59], %73 {strides = array<i32>} : memref<40x60xf32, #tpu.memory_space<vmem>>, vector<8x60xf32>,
    %c2_60 = arith.constant 2 : index
    %c0_61 = arith.constant 0 : index
    %c0_62 = arith.constant 0 : index
    %94 = vector.load %arg3[%c2_60, %c0_61, %c0_62] : memref<3x60x60xf32, #tpu.memory_space<vmem>>, vector<1x60x60xf32>
    %95 = vector.shape_cast %94 : vector<1x60x60xf32> to vector<60x60xf32>
    %c3 = arith.constant 3 : index
    %c0_63 = arith.constant 0 : index
    %96 = vector.load %arg5[%c3, %c0_63] : memref<8x64xf32, #tpu.memory_space<vmem>>, vector<1x60xf32>
    %c0_64 = arith.constant 0 : index
    %c0_65 = arith.constant 0 : index
    %97 = vector.load %arg7[%c0_64, %c0_65] : memref<40x60xf32, #tpu.memory_space<vmem>>, vector<40x60xf32>
    %cst_66 = arith.constant dense<0.000000e+00> : vector<40x60xf32>
    %98 = tpu.matmul %97, %95, %cst_66 {dimension_numbers = #tpu.dot_dimension_numbers<[1], [0], [0], [1], [0, 0, 1, 1], [], []>} : vector<40x60xf32>, vector<60x60xf32>, vector<40x60xf32> -> vector<40x60xf32>
    %99 = vector.extract_strided_slice %98 {offsets = [32, 0], sizes = [8, 60], strides = [1, 1]} : vector<40x60xf32> to vector<8x60xf32>
    %100 = vector.broadcast %96 : vector<1x60xf32> to vector<8x60xf32>
    %101 = arith.addf %99, %100 : vector<8x60xf32>
    %cst_67 = arith.constant 0.000000e+00 : f32
    %102 = vector.broadcast %cst_67 : f32 to vector<8x60xf32>
    %103 = arith.cmpf ogt, %101, %102 : vector<8x60xf32>
    %104 = arith.extui %103 : vector<8x60xi1> to vector<8x60xi32>
    %105 = arith.sitofp %104 : vector<8x60xi32> to vector<8x60xf32>
    %106 = arith.mulf %101, %105 : vector<8x60xf32>
    %107 = vector.extract_strided_slice %98 {offsets = [24, 0], sizes = [8, 60], strides = [1, 1]} : vector<40x60xf32> to vector<8x60xf32>
    %108 = vector.broadcast %96 : vector<1x60xf32> to vector<8x60xf32>
    %109 = arith.addf %107, %108 : vector<8x60xf32>
    %c0_68 = arith.constant 0 : index
    %c192 = arith.constant 192 : index
    %110 = vector.load %arg6[%c0_68, %c192] : memref<8x1024xf32, #tpu.memory_space<vmem>>, vector<8x60xf32>
    tpu.vector_store %arg6[%c0_68, %c192], %105 {strides = array<i32>} : memref<8x1024xf32, #tpu.memory_space<vmem>>, vector<8x60xf32>,
    %111 = vector.extract_strided_slice %98 {offsets = [0, 0], sizes = [8, 60], strides = [1, 1]} : vector<40x60xf32> to vector<8x60xf32>
    %c0_69 = arith.constant 0 : index
    %c768 = arith.constant 768 : index
    %112 = vector.load %arg6[%c0_69, %c768] : memref<8x1024xf32, #tpu.memory_space<vmem>>, vector<8x60xf32>
    tpu.vector_store %arg6[%c0_69, %c768], %111 {strides = array<i32>} : memref<8x1024xf32, #tpu.memory_space<vmem>>, vector<8x60xf32>,
    %113 = arith.mulf %111, %105 : vector<8x60xf32>
    %c0_70 = arith.constant 0 : index
    %c0_71 = arith.constant 0 : index
    %114 = vector.load %arg7[%c0_70, %c0_71] : memref<40x60xf32, #tpu.memory_space<vmem>>, vector<8x60xf32>
    tpu.vector_store %arg7[%c0_70, %c0_71], %113 {strides = array<i32>} : memref<40x60xf32, #tpu.memory_space<vmem>>, vector<8x60xf32>,
    %115 = vector.extract_strided_slice %98 {offsets = [8, 0], sizes = [8, 60], strides = [1, 1]} : vector<40x60xf32> to vector<8x60xf32>
    %c0_72 = arith.constant 0 : index
    %c832 = arith.constant 832 : index
    %116 = vector.load %arg6[%c0_72, %c832] : memref<8x1024xf32, #tpu.memory_space<vmem>>, vector<8x60xf32>
    tpu.vector_store %arg6[%c0_72, %c832], %115 {strides = array<i32>} : memref<8x1024xf32, #tpu.memory_space<vmem>>, vector<8x60xf32>,
    %117 = arith.mulf %115, %105 : vector<8x60xf32>
    %c8_73 = arith.constant 8 : index
    %c0_74 = arith.constant 0 : index
    %118 = vector.load %arg7[%c8_73, %c0_74] : memref<40x60xf32, #tpu.memory_space<vmem>>, vector<8x60xf32>
    tpu.vector_store %arg7[%c8_73, %c0_74], %117 {strides = array<i32>} : memref<40x60xf32, #tpu.memory_space<vmem>>, vector<8x60xf32>,
    %119 = vector.extract_strided_slice %98 {offsets = [16, 0], sizes = [8, 60], strides = [1, 1]} : vector<40x60xf32> to vector<8x60xf32>
    %c0_75 = arith.constant 0 : index
    %c896 = arith.constant 896 : index
    %120 = vector.load %arg6[%c0_75, %c896] : memref<8x1024xf32, #tpu.memory_space<vmem>>, vector<8x60xf32>
    tpu.vector_store %arg6[%c0_75, %c896], %119 {strides = array<i32>} : memref<8x1024xf32, #tpu.memory_space<vmem>>, vector<8x60xf32>,
    %121 = arith.mulf %119, %105 : vector<8x60xf32>
    %c16_76 = arith.constant 16 : index
    %c0_77 = arith.constant 0 : index
    %122 = vector.load %arg7[%c16_76, %c0_77] : memref<40x60xf32, #tpu.memory_space<vmem>>, vector<8x60xf32>
    tpu.vector_store %arg7[%c16_76, %c0_77], %121 {strides = array<i32>} : memref<40x60xf32, #tpu.memory_space<vmem>>, vector<8x60xf32>,
    %c0_78 = arith.constant 0 : index
    %c960 = arith.constant 960 : index
    %123 = vector.load %arg6[%c0_78, %c960] : memref<8x1024xf32, #tpu.memory_space<vmem>>, vector<8x60xf32>
    tpu.vector_store %arg6[%c0_78, %c960], %109 {strides = array<i32>} : memref<8x1024xf32, #tpu.memory_space<vmem>>, vector<8x60xf32>,
    %124 = arith.mulf %109, %105 : vector<8x60xf32>
    %c24_79 = arith.constant 24 : index
    %c0_80 = arith.constant 0 : index
    %125 = vector.load %arg7[%c24_79, %c0_80] : memref<40x60xf32, #tpu.memory_space<vmem>>, vector<8x60xf32>
    tpu.vector_store %arg7[%c24_79, %c0_80], %124 {strides = array<i32>} : memref<40x60xf32, #tpu.memory_space<vmem>>, vector<8x60xf32>,
    %c32_81 = arith.constant 32 : index
    %c0_82 = arith.constant 0 : index
    %126 = vector.load %arg7[%c32_81, %c0_82] : memref<40x60xf32, #tpu.memory_space<vmem>>, vector<8x60xf32>
    tpu.vector_store %arg7[%c32_81, %c0_82], %106 {strides = array<i32>} : memref<40x60xf32, #tpu.memory_space<vmem>>, vector<8x60xf32>,
    %c0_83 = arith.constant 0 : index
    %c0_84 = arith.constant 0 : index
    %127 = vector.load %arg4[%c0_83, %c0_84] : memref<60x1xf32, #tpu.memory_space<vmem>>, vector<60x1xf32>
    %c4 = arith.constant 4 : index
    %c0_85 = arith.constant 0 : index
    %128 = vector.load %arg5[%c4, %c0_85] : memref<8x64xf32, #tpu.memory_space<vmem>>, vector<1x1xf32>
    %c0_86 = arith.constant 0 : index
    %c0_87 = arith.constant 0 : index
    %129 = vector.load %arg7[%c0_86, %c0_87] : memref<40x60xf32, #tpu.memory_space<vmem>>, vector<40x60xf32>
    %cst_88 = arith.constant dense<0.000000e+00> : vector<40x1xf32>
    %130 = tpu.matmul %129, %127, %cst_88 {dimension_numbers = #tpu.dot_dimension_numbers<[1], [0], [0], [1], [0, 0, 1, 1], [], []>} : vector<40x60xf32>, vector<60x1xf32>, vector<40x1xf32> -> vector<40x1xf32>
    %131 = vector.extract_strided_slice %130 {offsets = [0, 0], sizes = [8, 1], strides = [1, 1]} : vector<40x1xf32> to vector<8x1xf32>
    %c0_89 = arith.constant 0 : index
    %c60 = arith.constant 60 : index
    %132 = vector.load %arg6[%c0_89, %c60] : memref<8x1024xf32, #tpu.memory_space<vmem>>, vector<8x1xf32>
    tpu.vector_store %arg6[%c0_89, %c60], %131 {strides = array<i32>} : memref<8x1024xf32, #tpu.memory_space<vmem>>, vector<8x1xf32>,
    %133 = vector.extract_strided_slice %130 {offsets = [8, 0], sizes = [8, 1], strides = [1, 1]} : vector<40x1xf32> to vector<8x1xf32>
    %c0_90 = arith.constant 0 : index
    %c61 = arith.constant 61 : index
    %134 = vector.load %arg6[%c0_90, %c61] : memref<8x1024xf32, #tpu.memory_space<vmem>>, vector<8x1xf32>
    tpu.vector_store %arg6[%c0_90, %c61], %133 {strides = array<i32>} : memref<8x1024xf32, #tpu.memory_space<vmem>>, vector<8x1xf32>,
    %135 = vector.extract_strided_slice %130 {offsets = [16, 0], sizes = [8, 1], strides = [1, 1]} : vector<40x1xf32> to vector<8x1xf32>
    %c0_91 = arith.constant 0 : index
    %c62 = arith.constant 62 : index
    %136 = vector.load %arg6[%c0_91, %c62] : memref<8x1024xf32, #tpu.memory_space<vmem>>, vector<8x1xf32>
    tpu.vector_store %arg6[%c0_91, %c62], %135 {strides = array<i32>} : memref<8x1024xf32, #tpu.memory_space<vmem>>, vector<8x1xf32>,
    %137 = vector.extract_strided_slice %130 {offsets = [24, 0], sizes = [8, 1], strides = [1, 1]} : vector<40x1xf32> to vector<8x1xf32>
    %138 = vector.broadcast %128 : vector<1x1xf32> to vector<8x1xf32>
    %139 = arith.addf %137, %138 : vector<8x1xf32>
    %c0_92 = arith.constant 0 : index
    %c63 = arith.constant 63 : index
    %140 = vector.load %arg6[%c0_92, %c63] : memref<8x1024xf32, #tpu.memory_space<vmem>>, vector<8x1xf32>
    tpu.vector_store %arg6[%c0_92, %c63], %139 {strides = array<i32>} : memref<8x1024xf32, #tpu.memory_space<vmem>>, vector<8x1xf32>,
    %141 = vector.extract_strided_slice %130 {offsets = [32, 0], sizes = [8, 1], strides = [1, 1]} : vector<40x1xf32> to vector<8x1xf32>
    %142 = vector.broadcast %128 : vector<1x1xf32> to vector<8x1xf32>
    %143 = arith.addf %141, %142 : vector<8x1xf32>
    %c0_93 = arith.constant 0 : index
    %c124 = arith.constant 124 : index
    %144 = vector.load %arg6[%c0_93, %c124] : memref<8x1024xf32, #tpu.memory_space<vmem>>, vector<8x1xf32>
    tpu.vector_store %arg6[%c0_93, %c124], %143 {strides = array<i32>} : memref<8x1024xf32, #tpu.memory_space<vmem>>, vector<8x1xf32>,
    return
  }
  func.func @transform_0(%arg0: i32) -> (i32, i32) {
    %c0_i32 = arith.constant 0 : i32
    %c0_i32_0 = arith.constant 0 : i32
    return %arg0, %c0_i32 : i32, i32
  }
  func.func @transform_1(%arg0: i32) -> (i32, i32) {
    %c0_i32 = arith.constant 0 : i32
    %c0_i32_0 = arith.constant 0 : i32
    %c0_i32_1 = arith.constant 0 : i32
    return %c0_i32, %c0_i32_0 : i32, i32
  }
  func.func @transform_2(%arg0: i32) -> (i32, i32, i32) {
    %c0_i32 = arith.constant 0 : i32
    %c0_i32_0 = arith.constant 0 : i32
    %c0_i32_1 = arith.constant 0 : i32
    %c0_i32_2 = arith.constant 0 : i32
    return %c0_i32, %c0_i32_0, %c0_i32_1 : i32, i32, i32
  }
  func.func @transform_3(%arg0: i32) -> (i32, i32) {
    %c0_i32 = arith.constant 0 : i32
    %c0_i32_0 = arith.constant 0 : i32
    %c0_i32_1 = arith.constant 0 : i32
    return %c0_i32, %c0_i32_0 : i32, i32
  }
  func.func @transform_4(%arg0: i32) -> (i32, i32) {
    %c0_i32 = arith.constant 0 : i32
    %c0_i32_0 = arith.constant 0 : i32
    %c0_i32_1 = arith.constant 0 : i32
    return %c0_i32, %c0_i32_0 : i32, i32
  }
  func.func @transform_5(%arg0: i32) -> (i32, i32) {
    %c0_i32 = arith.constant 0 : i32
    %c0_i32_0 = arith.constant 0 : i32
    return %arg0, %c0_i32 : i32, i32
  }
}

</mosaic_0001>

<bundles_post_ra>
// kernel: chair_mlp_forward.1
= control target key start
LH: loop header
LB: loop body
LE: loop exit
PB: predicated region body
PF: predicated region fallthrough
CT: control target
= control target key end

     0   :  { %s1333_s18 = smov 0   ;;  %s1645_s0 = inlined_call_operand.vmem [shape: f32[40,3], index: 0, kind: input, shape index: {}]   ;;  %s1646_s1 = inlined_call_operand.vmem [shape: f32[3,60], index: 1, kind: input, shape index: {}]   ;;  %s1647_s2 = inlined_call_operand.vmem [shape: f32[3,60,60], index: 2, kind: input, shape index: {}]   ;;  %s1648_s3 = inlined_call_operand.vmem [shape: f32[60,1], index: 3, kind: input, shape index: {}]   ;;  %s1649_s4 = inlined_call_operand.vmem [shape: f32[8,64], index: 4, kind: input, shape index: {}]   ;;  %s1650_s5 = inlined_call_operand.vmem [shape: f32[40,1024], index: 5, kind: output, shape index: {}]  }
   0x1 LB: > { %s1021_s19 = sadd.s32 4294967295, %s1293_s18   ;;  %p1025_p0 = scmp.ge.s32.totalorder %s1293_s18, 1  ;;  %s1293_s18 = sphi %s1333_s18, %s15_s18  }
   0x2   : > { %p186_p1 = scmp.lt.s32.totalorder %s1293_s18, 6 }
   0x4   : > { %p187_p2 = pnand %p1025_p0, %p186_p1 }
   0x5   : > { %p213_p3 = scmp.lt.s32.totalorder (!%p187_p2), %s1021_s19, 4  ;;  %s1297_s15 = smov (!%p187_p2), 64  }
   0x6   : > { %190 = sbr.rel (%p187_p2) target bundleno = 1219 (0x4c3), region = 40  ;;  %s1298_s9 = smov (!%p187_p2), 60  }
   0x7   : > { %s1299_s10 = smov (!%p187_p2), 61   ;;  %s1300_s11 = smov (!%p187_p2), 62  }
   0x8   : > { %s1301_s14 = smov (!%p187_p2), 63   ;;  %s1302_s16 = smov (!%p187_p2), 124  }
   0xb   : > { %v223_v0 = vld [vmem:[%s1646_s1] sm:$0x7]  ;;  %vm233_vm0 = vcmask 1042432   ;;  %v1295_v1 = vmov 0.0   ;;  %vm1296_vm1 = vmmov 0   ;;  %s1652_s19 = smov (!%p213_p3, %s1021_s19), 4  ;;  %v313_v11 = vlaneseq }
   0xc   : > { %1137 = vmatprep.subr.mxu0 %v1295_v1  ;;  %1139 = vmatprep.mubr.msk.f32.mxu0 %vm1296_vm1, %v1295_v1  ;;  %s1026_s22 = sshll.u32 %s1652_s19, 3  ;;  %vm229_vm2 = vcmask 23552   ;;  %v341_v3 = vld [vmem:[%s1647_s2 + $0x38] sm:$0xf]  ;;  %vm363_vm3 = vcmask 1043456   ;;  %v340_v4 = vld [vmem:[%s1647_s2 + $0x30] sm:$0xff] }
   0xd   : > { %1138 = vmatpush3.msk.msra.mxu0 %vm233_vm0, %v223_v0  ;;  %1142 = vmatprep.subr.mxu1 %v1295_v1  ;;  %s216_s25 = scalar_lea.vmem %s1645_s0, %s1026_s22  ;;  %v339_v5 = vld [vmem:[%s1647_s2 + $0x28] sm:$0xff]  ;;  %v338_v6 = vld [vmem:[%s1647_s2 + $0x20] sm:$0xff]  ;;  %v337_v7 = vld [vmem:[%s1647_s2 + $0x18] sm:$0xff]  ;;  %v314_v12 = vshrl.u32 %v313_v11, 7  ;;  %s1082_s21 = sshll.u32 %s1652_s19, 6  ;;  %vm311_vm4 = vcmask 490496  }
   0xe   : > { %1158 = vmatprep.mubr.msk.f32.mxu1 %vm1296_vm1, %v1295_v1  ;;  %1173 = vmatprep.subr.mxu0 %v1295_v1  ;;  %v222_v2 = vld [vmem:[%s216_s25] sm:$0xff]  ;;  %v336_v8 = vld [vmem:[%s1647_s2 + $0x10] sm:$0xff]  ;;  %v335_v9 = vld [vmem:[%s1647_s2 + $0x8] sm:$0xff]  ;;  %s1399_s24 = scalar_lea.vmem %s1650_s5, %s1082_s21  ;;  %vm471_vm7 = vcmask 1015296   ;;  %vm934_vm10 = vcmask 499168   ;;  %vm940_vm11 = vcmask 507368  }
   0xf   : > { %1140 = vmatmul.mubr.msk.f32.vlgmr.msra.gmra.mxu0 %vm229_vm2, %v222_v2  ;;  %1143 = vmatpush3.msk.msra.mxu1 %vm363_vm3, %v341_v3  ;;  %v334_v10 = vld [vmem:[%s1647_s2] sm:$0xff]  ;;  %v315_v13 = vsub.s32 0, %v314_v12  ;;  %v321_v14 = vsub.s32 1, %v314_v12  ;;  %v327_v15 = vsub.s32 2, %v314_v12  ;;  %v1048_v34 = vld [vmem:[%s1647_s2 + $0x78] sm:$0xf] }
  0x10   : > { %1189 = vmatprep.mubr.msk.f32.mxu0 %vm1296_vm1, %v1295_v1  ;;  %1144 = vmatprep.subr.mxu1 %v1295_v1  ;;  %v1029_v16 = vld [vmem:[%s1649_s4] ss:$0 sm:$0xff]  ;;  %v1047_v35 = vld [vmem:[%s1647_s2 + $0x70] sm:$0xff]  ;;  %v1046_v36 = vld [vmem:[%s1647_s2 + $0x68] sm:$0xff]  ;;  %vm946_vm12 = vcmask 515568   ;;  %vm957_vm13 = vcmask 523768  }
  0x11   : > { %1145 = vmatpush3.msra.mxu1 %v340_v4  ;;  %v316_v18 = vrot.slane %v223_v0, %v315_v13  ;;  %v322_v19 = vrot.slane %v223_v0, %v321_v14  ;;  %v328_v20 = vrot.slane %v223_v0, %v327_v15  ;;  %1174 = vmatpush3.msk.msra.mxu0 %vm363_vm3, %v1048_v34  ;;  %v1045_v37 = vld [vmem:[%s1647_s2 + $0x60] sm:$0xff]  ;;  %v1044_v38 = vld [vmem:[%s1647_s2 + $0x58] sm:$0xff]  ;;  %v1043_v39 = vld [vmem:[%s1647_s2 + $0x50] sm:$0xff]  ;;  %vm964_vm14 = vcmask 1023968  }
  0x12   : > { %1146 = vmatprep.subr.mxu1 %v1295_v1  ;;  %1175 = vmatprep.subr.mxu0 %v1295_v1  ;;  %v1042_v40 = vld [vmem:[%s1647_s2 + $0x48] sm:$0xff]  ;;  %v1041_v41 = vld [vmem:[%s1647_s2 + $0x40] sm:$0xff]  ;;  %v1064_v3 = vld [vmem:[%s1647_s2 + $0xb8] sm:$0xf] }
  0x13   : > { %1147 = vmatpush3.msra.mxu1 %v339_v5  ;;  %1176 = vmatpush3.msra.mxu0 %v1047_v35  ;;  %v1039_v48 = vld [vmem:[%s1649_s4 + $0x1] ss:$0 sm:$0xff]  ;;  %v1063_v4 = vld [vmem:[%s1647_s2 + $0xb0] sm:$0xff]  ;;  %v1062_v5 = vld [vmem:[%s1647_s2 + $0xa8] sm:$0xff] }
  0x14   : > { %1148 = vmatprep.subr.mxu1 %v1295_v1  ;;  %1177 = vmatprep.subr.mxu0 %v1295_v1  ;;  %v1057_v11 = vld [vmem:[%s1647_s2 + $0x80] sm:$0xff] }
  0x15   : > { %1149 = vmatpush3.msra.mxu1 %v338_v6  ;;  %1178 = vmatpush3.msra.mxu0 %v1046_v36  ;;  %v1061_v6 = vld [vmem:[%s1647_s2 + $0xa0] sm:$0xff] }
  0x16   : > { %1150 = vmatprep.subr.mxu1 %v1295_v1  ;;  %1179 = vmatprep.subr.mxu0 %v1295_v1 }
  0x17   : > { %1151 = vmatpush3.msra.mxu1 %v337_v7  ;;  %1180 = vmatpush3.msra.mxu0 %v1045_v37  ;;  %v815_v37 = vld [vmem:[%s1648_s3 + $0x38] sm:$0xf] }
  0x18   : > { %1152 = vmatprep.subr.mxu1 %v1295_v1  ;;  %1181 = vmatprep.subr.mxu0 %v1295_v1 }
  0x19   : > { %1153 = vmatpush3.msra.mxu1 %v336_v8  ;;  %1182 = vmatpush3.msra.mxu0 %v1044_v38  ;;  %v1060_v8 = vld [vmem:[%s1647_s2 + $0x98] sm:$0xff]  ;;  %v814_v38 = vld [vmem:[%s1648_s3 + $0x30] sm:$0xff] }
  0x1a   : > { %1154 = vmatprep.subr.mxu1 %v1295_v1  ;;  %1183 = vmatprep.subr.mxu0 %v1295_v1 }
  0x1b   : > { %1155 = vmatpush3.msra.mxu1 %v335_v9  ;;  %1184 = vmatpush3.msra.mxu0 %v1043_v39  ;;  %v1059_v9 = vld [vmem:[%s1647_s2 + $0x90] sm:$0xff]  ;;  %v813_v39 = vld [vmem:[%s1648_s3 + $0x28] sm:$0xff] }
  0x1c   : > { %1156 = vmatprep.subr.mxu1 %v1295_v1  ;;  %1185 = vmatprep.subr.mxu0 %v1295_v1 }
  0x1d   : > { %1157 = vmatpush3.msra.mxu1 %v334_v10  ;;  %1186 = vmatpush3.msra.mxu0 %v1042_v40  ;;  %v1058_v10 = vld [vmem:[%s1647_s2 + $0x88] sm:$0xff]  ;;  %v812_v40 = vld [vmem:[%s1648_s3 + $0x20] sm:$0xff] }
  0x1e   : > { %1204 = vmatprep.subr.mxu1 %v1295_v1  ;;  %1187 = vmatprep.subr.mxu0 %v1295_v1 }
  0x1f   : > { %1188 = vmatpush3.msra.mxu0 %v1041_v41 }
  0x20   : > { %1235 = vmatprep.subr.mxu0 %v1295_v1 }
  0xcf   : > { %v303_v17 = vpop.f32.mrf.mxu0 }
  0xd0   : > { %v304_v21 = vadd.f32 %v1029_v16, %v303_v17 }
  0xd1   : > { %v1141_v22 = vpop.f32.mrf.mxu0 }
  0xd2   : > { %vm307_vm5 = vcmp.gt.f32.partialorder %v304_v21, 0.0 }
  0xd3   : > { %v1032_v23 = vsel %vm307_vm5, 1.0, %v1295_v1 }
  0xd4   : > { %v310_v24 = vmul.f32 %v1032_v23, %v304_v21  ;;  %v317_v25 = vmul.f32 %v1032_v23, %v316_v18  ;;  %v323_v26 = vmul.f32 %v1032_v23, %v322_v19  ;;  %v329_v27 = vmul.f32 %v1032_v23, %v328_v20  ;;  %312 = vst.msk [vmem:[%s1399_s24] sm:$0xff] %vm311_vm4, %v1032_v23  ;;  %v1055_v19 = vld [vmem:[%s1649_s4 + $0x2] ss:$0 sm:$0xff] }
  0xd5   : > { %v331_v28 = vmul.f32 %v1032_v23, %v1029_v16 }
  0xd6   : > { %318 = vst.msk [vmem:[#allocation2] sm:$0xff] %vm311_vm4, %v317_v25  ;;  %324 = vst.msk [vmem:[#allocation2 + $0x8] sm:$0xff] %vm311_vm4, %v323_v26 }
  0xd7   : > { %330 = vst.msk [vmem:[#allocation2 + $0x10] sm:$0xff] %vm311_vm4, %v329_v27  ;;  %333 = vst.msk [vmem:[#allocation2 + $0x20] sm:$0xff] %vm311_vm4, %v310_v24 }
  0xd8   : > { %332 = vst.msk [vmem:[#allocation2 + $0x18] sm:$0xff] %vm311_vm4, %v331_v28 }
  0xdd   : > { %v343_v29 = vld [vmem:[#allocation2] sm:$0xff]  ;;  %v344_v30 = vld [vmem:[#allocation2 + $0x8] sm:$0xff] }
  0xde   : > { %1159 = vmatmul.mubr.msk.f32.vlgmr.msra.gmra.mxu1 %vm311_vm4, %v343_v29  ;;  %v345_v31 = vld [vmem:[#allocation2 + $0x10] sm:$0xff]  ;;  %v347_v33 = vld [vmem:[#allocation2 + $0x20] sm:$0xff] }
  0xdf   : > { %1161 = vmatprep.mubr.msk.f32.mxu1 %vm1296_vm1, %v1295_v1  ;;  %v346_v32 = vld [vmem:[#allocation2 + $0x18] sm:$0xff]  ;;  %1205 = vmatpush3.msk.msra.mxu1 %vm363_vm3, %v1064_v3 }
  0xe0   : > { %1206 = vmatprep.subr.mxu1 %v1295_v1 }
  0xe1   : > { %1207 = vmatpush3.msra.mxu1 %v1063_v4 }
  0xe2   : > { %1162 = vmatmul.mubr.msk.f32.gmra.mxu1 %vm311_vm4, %v344_v30  ;;  %1208 = vmatprep.subr.mxu1 %v1295_v1 }
  0xe3   : > { %1164 = vmatprep.mubr.msk.f32.mxu1 %vm1296_vm1, %v1295_v1  ;;  %1209 = vmatpush3.msra.mxu1 %v1062_v5 }
  0xe4   : > { %1210 = vmatprep.subr.mxu1 %v1295_v1 }
  0xe5   : > { %1211 = vmatpush3.msra.mxu1 %v1061_v6 }
  0xe6   : > { %1165 = vmatmul.mubr.msk.f32.gmra.mxu1 %vm311_vm4, %v345_v31  ;;  %1212 = vmatprep.subr.mxu1 %v1295_v1 }
  0xe7   : > { %1167 = vmatprep.mubr.msk.f32.mxu1 %vm1296_vm1, %v1295_v1  ;;  %1213 = vmatpush3.msra.mxu1 %v1060_v8 }
  0xe8   : > { %1214 = vmatprep.subr.mxu1 %v1295_v1 }
  0xe9   : > { %1215 = vmatpush3.msra.mxu1 %v1059_v9 }
  0xea   : > { %1168 = vmatmul.mubr.msk.f32.gmra.mxu1 %vm311_vm4, %v346_v32  ;;  %1216 = vmatprep.subr.mxu1 %v1295_v1 }
  0xeb   : > { %1170 = vmatprep.mubr.msk.f32.mxu1 %vm1296_vm1, %v1295_v1  ;;  %1217 = vmatpush3.msra.mxu1 %v1058_v10 }
  0xec   : > { %1218 = vmatprep.subr.mxu1 %v1295_v1 }
  0xed   : > { %1219 = vmatpush3.msra.mxu1 %v1057_v11 }
  0xee   : > { %1171 = vmatmul.mubr.msk.f32.gmra.mxu1 %vm311_vm4, %v347_v33 }
  0xef   : > { %1220 = vmatprep.mubr.msk.f32.mxu1 %vm1296_vm1, %v1295_v1 }
 0x19e   : > { %v433_v42 = vpop.f32.mrf.mxu1 }
 0x19f   : > { %473 = vst.msk [vmem:[%s1399_s24 + $0x10] sm:$0xff] %vm311_vm4, %v433_v42 }
 0x1a0   : > { %v1160_v43 = vpop.f32.mrf.mxu1 }
 0x1a1   : > { %v810_v43 = vld [vmem:[%s1648_s3 + $0x10] sm:$0xff] }
 0x1a2   : > { %v438_v44 = vpop.f32.mrf.mxu1 }
 0x1a3   : > { %477 = vrot.lane.b32.xlu1 %v438_v44, %s1297_s15 }
 0x1a4   : > { %v1163_v45 = vpop.f32.mrf.mxu1 }
 0x1a5   : > { %v808_v45 = vld [vmem:[%s1648_s3] sm:$0xff] }
 0x1a6   : > { %v443_v46 = vpop.f32.mrf.mxu1 }
 0x1a7   : > { %483 = vst.msk [vmem:[%s1399_s24 + $0x18] sm:$0xff] %vm311_vm4, %v443_v46 }
 0x1a8   : > { %v1166_v47 = vpop.f32.mrf.mxu1 }
 0x1aa   : > { %v448_v49 = vpop.f32.mrf.mxu1 }
 0x1ab   : > { %v466_v50 = vadd.f32 %v1039_v48, %v448_v49 }
 0x1ac   : > { %v1169_v51 = vpop.f32.mrf.mxu1 }
 0x1ad   : > { %487 = vrot.lane.b32.xlu0 %v466_v50, %s1297_s15 }
 0x1ae   : > { %v453_v52 = vpop.f32.mrf.mxu1 }
 0x1af   : > { %v461_v53 = vadd.f32 %v1039_v48, %v453_v52 }
 0x1b0   : > { %v1172_v54 = vpop.f32.mrf.mxu1 }
 0x1b1   : > { %vm462_vm6 = vcmp.gt.f32.partialorder %v461_v53, 0.0 }
 0x1b2   : > { %v1467_v55 = vsel %vm462_vm6, 1.0, %v1295_v1 }
 0x1b3   : > { %v465_v56 = vmul.f32 %v1467_v55, %v461_v53  ;;  %v474_v57 = vmul.f32 %v1467_v55, %v433_v42  ;;  %v481_v58 = vmul.f32 %v1467_v55, %v438_v44  ;;  %v484_v59 = vmul.f32 %v1467_v55, %v443_v46  ;;  %v811_v42 = vld [vmem:[%s1648_s3 + $0x18] sm:$0xff]  ;;  %v809_v44 = vld [vmem:[%s1648_s3 + $0x8] sm:$0xff] }
 0x1b4   : > { %v491_v60 = vmul.f32 %v1467_v55, %v466_v50 }
 0x1b5   : > { %475 = vst.msk [vmem:[#allocation2] sm:$0xff] %vm311_vm4, %v474_v57  ;;  %482 = vst.msk [vmem:[#allocation2 + $0x8] sm:$0xff] %vm311_vm4, %v481_v58 }
 0x1b6   : > { %485 = vst.msk [vmem:[#allocation2 + $0x10] sm:$0xff] %vm311_vm4, %v484_v59  ;;  %493 = vst.msk [vmem:[#allocation2 + $0x20] sm:$0xff] %vm311_vm4, %v465_v56  ;;  %v1071_v56 = vld [vmem:[%s1649_s4 + $0x3] ss:$0 sm:$0xff] }
 0x1b7   : > { %492 = vst.msk [vmem:[#allocation2 + $0x18] sm:$0xff] %vm311_vm4, %v491_v60 }
 0x1bc   : > { %v504_v61 = vld [vmem:[#allocation2] sm:$0xff]  ;;  %v505_v62 = vld [vmem:[#allocation2 + $0x8] sm:$0xff] }
 0x1bd   : > { %1190 = vmatmul.mubr.msk.f32.vlgmr.msra.gmra.mxu0 %vm311_vm4, %v504_v61  ;;  %v506_v63 = vld [vmem:[#allocation2 + $0x10] sm:$0xff]  ;;  %v508_v2 = vld [vmem:[#allocation2 + $0x20] sm:$0xff] }
 0x1be   : > { %1192 = vmatprep.mubr.msk.f32.mxu0 %vm1296_vm1, %v1295_v1  ;;  %v507_v0 = vld [vmem:[#allocation2 + $0x18] sm:$0xff]  ;;  %1236 = vmatpush3.msk.msra.mxu0 %vm363_vm3, %v815_v37 }
 0x1bf   : > { %1237 = vmatprep.subr.mxu0 %v1295_v1 }
 0x1c0   : > { %1238 = vmatpush3.msra.mxu0 %v814_v38 }
 0x1c1   : > { %1193 = vmatmul.mubr.msk.f32.gmra.mxu0 %vm311_vm4, %v505_v62  ;;  %1239 = vmatprep.subr.mxu0 %v1295_v1 }
 0x1c2   : > { %1195 = vmatprep.mubr.msk.f32.mxu0 %vm1296_vm1, %v1295_v1  ;;  %1240 = vmatpush3.msra.mxu0 %v813_v39 }
 0x1c3   : > { %1241 = vmatprep.subr.mxu0 %v1295_v1 }
 0x1c4   : > { %1242 = vmatpush3.msra.mxu0 %v812_v40 }
 0x1c5   : > { %1196 = vmatmul.mubr.msk.f32.gmra.mxu0 %vm311_vm4, %v506_v63  ;;  %1243 = vmatprep.subr.mxu0 %v1295_v1 }
 0x1c6   : > { %1198 = vmatprep.mubr.msk.f32.mxu0 %vm1296_vm1, %v1295_v1  ;;  %1244 = vmatpush3.msra.mxu0 %v811_v42 }
 0x1c7   : > { %1245 = vmatprep.subr.mxu0 %v1295_v1 }
 0x1c8   : > { %1246 = vmatpush3.msra.mxu0 %v810_v43 }
 0x1c9   : > { %1199 = vmatmul.mubr.msk.f32.gmra.mxu0 %vm311_vm4, %v507_v0  ;;  %1247 = vmatprep.subr.mxu0 %v1295_v1 }
 0x1ca   : > { %1201 = vmatprep.mubr.msk.f32.mxu0 %vm1296_vm1, %v1295_v1  ;;  %1248 = vmatpush3.msra.mxu0 %v809_v44 }
 0x1cb   : > { %1249 = vmatprep.subr.mxu0 %v1295_v1 }
 0x1cc   : > { %1250 = vmatpush3.msra.mxu0 %v808_v45 }
 0x1cd   : > { %1202 = vmatmul.mubr.msk.f32.gmra.mxu0 %vm311_vm4, %v508_v2 }
 0x1ce   : > { %1251 = vmatprep.mubr.msk.f32.mxu0 %vm1296_vm1, %v1295_v1 }
 0x215   : > { %v478_v7 = vpop.permute.xlu1 %477 }
 0x216   : > { %480 = vst.msk [vmem:[%s1399_s24 + $0x10] sm:$0xff] %vm471_vm7, %v478_v7 }
 0x21f   : > { %v488_v12 = vpop.permute.xlu0 %487 }
 0x220   : > { %490 = vst.msk [vmem:[%s1399_s24 + $0x18] sm:$0xff] %vm471_vm7, %v488_v12 }
 0x27d   : > { %v593_v13 = vpop.f32.mrf.mxu0 }
 0x27e   : > { %628 = vst.msk [vmem:[%s1399_s24 + $0x20] sm:$0xff] %vm311_vm4, %v593_v13 }
 0x27f   : > { %v1191_v14 = vpop.f32.mrf.mxu0 }
 0x281   : > { %v598_v15 = vpop.f32.mrf.mxu0 }
 0x282   : > { %632 = vrot.lane.b32.xlu1 %v598_v15, %s1297_s15 }
 0x283   : > { %v1194_v16 = vpop.f32.mrf.mxu0 }
 0x285   : > { %v603_v17 = vpop.f32.mrf.mxu0 }
 0x286   : > { %638 = vst.msk [vmem:[%s1399_s24 + $0x28] sm:$0xff] %vm311_vm4, %v603_v17 }
 0x287   : > { %v1197_v18 = vpop.f32.mrf.mxu0 }
 0x288   : > { %v1079_v18 = vld [vmem:[%s1649_s4 + $0x4] ss:$0 sm:$0xff] }
 0x289   : > { %v608_v20 = vpop.f32.mrf.mxu0 }
 0x28a   : > { %v626_v21 = vadd.f32 %v1055_v19, %v608_v20 }
 0x28b   : > { %v1200_v22 = vpop.f32.mrf.mxu0 }
 0x28c   : > { %642 = vrot.lane.b32.xlu0 %v626_v21, %s1297_s15 }
 0x28d   : > { %v613_v23 = vpop.f32.mrf.mxu0 }
 0x28e   : > { %v621_v24 = vadd.f32 %v1055_v19, %v613_v23 }
 0x28f   : > { %v1203_v25 = vpop.f32.mrf.mxu0 }
 0x290   : > { %vm622_vm8 = vcmp.gt.f32.partialorder %v621_v24, 0.0 }
 0x291   : > { %v1056_v26 = vsel %vm622_vm8, 1.0, %v1295_v1 }
 0x292   : > { %v625_v27 = vmul.f32 %v1056_v26, %v621_v24  ;;  %627 = vst.msk [vmem:[%s1399_s24 + $0x8] sm:$0xff] %vm311_vm4, %v1056_v26  ;;  %v629_v28 = vmul.f32 %v1056_v26, %v593_v13  ;;  %v636_v29 = vmul.f32 %v1056_v26, %v598_v15  ;;  %v639_v30 = vmul.f32 %v1056_v26, %v603_v17 }
 0x293   : > { %v646_v31 = vmul.f32 %v1056_v26, %v626_v21 }
 0x294   : > { %630 = vst.msk [vmem:[#allocation2] sm:$0xff] %vm311_vm4, %v629_v28  ;;  %637 = vst.msk [vmem:[#allocation2 + $0x8] sm:$0xff] %vm311_vm4, %v636_v29 }
 0x295   : > { %640 = vst.msk [vmem:[#allocation2 + $0x10] sm:$0xff] %vm311_vm4, %v639_v30  ;;  %648 = vst.msk [vmem:[#allocation2 + $0x20] sm:$0xff] %vm311_vm4, %v625_v27 }
 0x296   : > { %647 = vst.msk [vmem:[#allocation2 + $0x18] sm:$0xff] %vm311_vm4, %v646_v31 }
 0x29b   : > { %v659_v32 = vld [vmem:[#allocation2] sm:$0xff]  ;;  %v660_v33 = vld [vmem:[#allocation2 + $0x8] sm:$0xff] }
 0x29c   : > { %1221 = vmatmul.mubr.msk.f32.vlgmr.msra.gmra.mxu1 %vm311_vm4, %v659_v32  ;;  %v661_v34 = vld [vmem:[#allocation2 + $0x10] sm:$0xff]  ;;  %v663_v36 = vld [vmem:[#allocation2 + $0x20] sm:$0xff] }
 0x29d   : > { %1223 = vmatprep.mubr.msk.f32.mxu1 %vm1296_vm1, %v1295_v1  ;;  %v662_v35 = vld [vmem:[#allocation2 + $0x18] sm:$0xff] }
 0x2a0   : > { %1224 = vmatmul.mubr.msk.f32.gmra.mxu1 %vm311_vm4, %v660_v33 }
 0x2a1   : > { %1226 = vmatprep.mubr.msk.f32.mxu1 %vm1296_vm1, %v1295_v1 }
 0x2a4   : > { %1227 = vmatmul.mubr.msk.f32.gmra.mxu1 %vm311_vm4, %v661_v34 }
 0x2a5   : > { %1229 = vmatprep.mubr.msk.f32.mxu1 %vm1296_vm1, %v1295_v1 }
 0x2a8   : > { %1230 = vmatmul.mubr.msk.f32.gmra.mxu1 %vm311_vm4, %v662_v35 }
 0x2a9   : > { %1232 = vmatprep.mubr.msk.f32.mxu1 %vm1296_vm1, %v1295_v1 }
 0x2ac   : > { %1233 = vmatmul.mubr.msk.f32.gmra.mxu1 %vm311_vm4, %v663_v36 }
 0x2f4   : > { %v633_v41 = vpop.permute.xlu1 %632 }
 0x2f5   : > { %635 = vst.msk [vmem:[%s1399_s24 + $0x20] sm:$0xff] %vm471_vm7, %v633_v41 }
 0x2fe   : > { %v643_v46 = vpop.permute.xlu0 %642 }
 0x2ff   : > { %645 = vst.msk [vmem:[%s1399_s24 + $0x28] sm:$0xff] %vm471_vm7, %v643_v46 }
 0x35c   : > { %v748_v47 = vpop.f32.mrf.mxu1 }
 0x35d   : > { %787 = vst.msk [vmem:[%s1399_s24 + $0x30] sm:$0xff] %vm311_vm4, %v748_v47 }
 0x35e   : > { %v1222_v48 = vpop.f32.mrf.mxu1 }
 0x360   : > { %v753_v49 = vpop.f32.mrf.mxu1 }
 0x361   : > { %791 = vrot.lane.b32.xlu1 %v753_v49, %s1297_s15 }
 0x362   : > { %v1225_v50 = vpop.f32.mrf.mxu1 }
 0x364   : > { %v758_v51 = vpop.f32.mrf.mxu1 }
 0x365   : > { %797 = vst.msk [vmem:[%s1399_s24 + $0x38] sm:$0xff] %vm311_vm4, %v758_v51 }
 0x366   : > { %v1228_v52 = vpop.f32.mrf.mxu1 }
 0x368   : > { %v763_v53 = vpop.f32.mrf.mxu1 }
 0x369   : > { %v781_v60 = vadd.f32 %v1071_v56, %v763_v53 }
 0x36a   : > { %v1231_v54 = vpop.f32.mrf.mxu1 }
 0x36c   : > { %v768_v57 = vpop.f32.mrf.mxu1 }
 0x36d   : > { %v776_v58 = vadd.f32 %v1071_v56, %v768_v57 }
 0x36e   : > { %v1234_v59 = vpop.f32.mrf.mxu1 }
 0x36f   : > { %vm777_vm9 = vcmp.gt.f32.partialorder %v776_v58, 0.0 }
 0x370   : > { %v1072_v61 = vsel %vm777_vm9, 1.0, %v1295_v1 }
 0x371   : > { %v780_v62 = vmul.f32 %v1072_v61, %v776_v58  ;;  %v788_v63 = vmul.f32 %v1072_v61, %v748_v47  ;;  %v795_v0 = vmul.f32 %v1072_v61, %v753_v49  ;;  %v798_v2 = vmul.f32 %v1072_v61, %v758_v51 }
 0x372   : > { %v805_v3 = vmul.f32 %v1072_v61, %v781_v60  ;;  %v1282_v4 = vpack.i.bf16 %v1072_v61, %v1467_v55 }
 0x373   : > { %789 = vst.msk [vmem:[#allocation2] sm:$0xff] %vm311_vm4, %v788_v63  ;;  %796 = vst.msk [vmem:[#allocation2 + $0x8] sm:$0xff] %vm311_vm4, %v795_v0 }
 0x374   : > { %799 = vst.msk [vmem:[#allocation2 + $0x10] sm:$0xff] %vm311_vm4, %v798_v2  ;;  %807 = vst.msk [vmem:[#allocation2 + $0x20] sm:$0xff] %vm311_vm4, %v780_v62  ;;  %1283 = vrot.lane.b32.xlu0 %v1282_v4, %s1297_s15 }
 0x375   : > { %806 = vst.msk [vmem:[#allocation2 + $0x18] sm:$0xff] %vm311_vm4, %v805_v3 }
 0x37a   : > { %v817_v5 = vld [vmem:[#allocation2] sm:$0xff]  ;;  %v818_v55 = vld [vmem:[#allocation2 + $0x8] sm:$0xff] }
 0x37b   : > { %1252 = vmatmul.mubr.msk.f32.vlgmr.msra.gmra.mxu0 %vm311_vm4, %v817_v5  ;;  %v819_v6 = vld [vmem:[#allocation2 + $0x10] sm:$0xff]  ;;  %v821_v8 = vld [vmem:[#allocation2 + $0x20] sm:$0xff] }
 0x37c   : > { %1254 = vmatprep.mubr.msk.f32.mxu0 %vm1296_vm1, %v1295_v1  ;;  %v820_v7 = vld [vmem:[#allocation2 + $0x18] sm:$0xff] }
 0x37f   : > { %1255 = vmatmul.mubr.msk.f32.gmra.mxu0 %vm311_vm4, %v818_v55 }
 0x380   : > { %1257 = vmatprep.mubr.msk.f32.mxu0 %vm1296_vm1, %v1295_v1 }
 0x383   : > { %1258 = vmatmul.mubr.msk.f32.gmra.mxu0 %vm311_vm4, %v819_v6 }
 0x384   : > { %1260 = vmatprep.mubr.msk.f32.mxu0 %vm1296_vm1, %v1295_v1 }
 0x387   : > { %1261 = vmatmul.mubr.msk.f32.gmra.mxu0 %vm311_vm4, %v820_v7 }
 0x388   : > { %1263 = vmatprep.mubr.msk.f32.mxu0 %vm1296_vm1, %v1295_v1 }
 0x38b   : > { %1264 = vmatmul.mubr.msk.f32.gmra.mxu0 %vm311_vm4, %v821_v8 }
 0x3d3   : > { %v792_v9 = vpop.permute.xlu1 %791 }
 0x3d4   : > { %794 = vst.msk [vmem:[%s1399_s24 + $0x30] sm:$0xff] %vm471_vm7, %v792_v9 }
 0x3e6   : > { %v1284_v10 = vpop.permute.xlu0 %1283 }
 0x3e7   : > { %v1286_v11 = vunpack.i.h.bf16 %v1284_v10  ;;  %v1285_v12 = vunpack.i.l.bf16 %v1284_v10 }
 0x3e9   : > { %786 = vst.msk [vmem:[%s1399_s24 + $0x8] sm:$0xff] %vm471_vm7, %v1286_v11  ;;  %472 = vst.msk [vmem:[%s1399_s24] sm:$0xff] %vm471_vm7, %v1285_v12 }
 0x43b   : > { %v906_v13 = vpop.f32.mrf.mxu0 }
 0x43c   : > { %931 = vrot.lane.b32.xlu0 %v906_v13, %s1298_s9 }
 0x43d   : > { %v1253_v14 = vpop.f32.mrf.mxu0 }
 0x43f   : > { %v911_v15 = vpop.f32.mrf.mxu0 }
 0x440   : > { %937 = vrot.lane.b32.xlu1 %v911_v15, %s1299_s10 }
 0x441   : > { %v1256_v1 = vpop.f32.mrf.mxu0 }
 0x443   : > { %v916_v16 = vpop.f32.mrf.mxu0 }
 0x444   : > { %943 = vrot.lane.b32.xlu1 %v916_v16, %s1300_s11 }
 0x445   : > { %v1259_v17 = vpop.f32.mrf.mxu0 }
 0x447   : > { %v921_v19 = vpop.f32.mrf.mxu0 }
 0x448   : > { %v952_v20 = vadd.f32 %v1079_v18, %v921_v19 }
 0x449   : > { %v1262_v21 = vpop.f32.mrf.mxu0 }
 0x44a   : > { %954 = vrot.lane.b32.xlu0 %v952_v20, %s1301_s14 }
 0x44b   : > { %v926_v22 = vpop.f32.mrf.mxu0 }
 0x44c   : > { %v959_v23 = vadd.f32 %v1079_v18, %v926_v22 }
 0x44d   : > { %v1265_v24 = vpop.f32.mrf.mxu0 }
 0x44e   : > { %801 = vrot.lane.b32.xlu0 %v781_v60, %s1297_s15  ;;  %961 = vrot.lane.b32.xlu1 %v959_v23, %s1302_s16 }
 0x4ae   : > { %v932_v25 = vpop.permute.xlu0 %931 }
 0x4af   : > { %935 = vst.msk [vmem:[%s1399_s24] sm:$0xff] %vm934_vm10, %v932_v25 }
 0x4b2   : > { %v938_v26 = vpop.permute.xlu1 %937 }
 0x4b3   : > { %941 = vst.msk [vmem:[%s1399_s24] sm:$0xff] %vm940_vm11, %v938_v26 }
 0x4b6   : > { %v944_v27 = vpop.permute.xlu1 %943 }
 0x4b7   : > { %947 = vst.msk [vmem:[%s1399_s24] sm:$0xff] %vm946_vm12, %v944_v27 }
 0x4bc   : > { %v955_v28 = vpop.permute.xlu0 %954 }
 0x4bd   : > { %958 = vst.msk [vmem:[%s1399_s24] sm:$0xff] %vm957_vm13, %v955_v28 }
 0x4c0   : > { %v802_v29 = vpop.permute.xlu0 %801  ;;  %v962_v30 = vpop.permute.xlu1 %961 }
 0x4c1   : > { %804 = vst.msk [vmem:[%s1399_s24 + $0x38] sm:$0xff] %vm471_vm7, %v802_v29 }
 0x4c2   : > { %965 = vst.msk [vmem:[%s1399_s24] sm:$0xff] %vm964_vm14, %v962_v30 }
 0x4c3 PF: > { %s15_s18 = sadd.s32 1, %s1293_s18  }
 0x4c4   : > { %p12_p4 = scmp.ge.s32.totalorder %s15_s18, 7  }
 0x4c6   :  { %14 = sbr.rel (!%p12_p4) target bundleno = 1 (0x1), region = 72 }

</bundles_post_ra>
